<compile_context>
chip_gen: v7x
topology: tpu7x:2x2x1
jax: 0.10.0
libtpu: 0.0.40
codegen_flags: <defaults>
</compile_context>

<pallas_src>
import functools
import math

import jax
import jax.numpy as jnp
from jax import lax
from jax.experimental import pallas as pl
from jax.experimental.pallas import tpu as pltpu

# ---------------- model hyper-parameters (small, consistent with the forward) -------------
B = 2                   # batch
D_MODEL = 32            # d_model
N_HEADS = 4
D_HEAD = D_MODEL // N_HEADS
WIN = 64                # L : original window length (x_ori sequence length)
PATCH = 8               # patch size  -> x_patch_num has PATCH tokens
N_PATCH = WIN // PATCH  # number of patches -> x_patch_size has N_PATCH tokens
E_LAYERS = 2            # number of encoder layers
N_PATCH_VARIANTS = 2    # patch_index selects among these projection sets
EPS = 1e-5              # LayerNorm eps (PyTorch default)
SCALE = 1.0 / math.sqrt(D_HEAD)

assert N_PATCH == PATCH, "branch-split grid assumes both branches share the same token count"
T_SMALL = PATCH                       # tokens per branch (8)
BHL = B * N_HEADS * WIN               # full-map rows (512)
BHT = N_HEADS * B * T_SMALL           # small-map rows (64), ordered (h, b, k)


# ---------------- fused kernel: one (layer, branch) per grid step --------------------------
def _encoder_fused_kernel(x_ref, wq_ref, wk_ref, erow_ref, ecol_ref, g_ref, b_ref, out_ref):
    # x_ref   : (1, B, T, D)        branch tokens
    # wq/wk   : (1, 1, D, H*dh)     head-fused projection weights for this (layer, branch)
    # erow    : (1, BHL, BHT)       0/1 row-expansion (constant per branch)
    # ecol    : (1, T, L)           0/1 column-expansion (constant per branch)
    # g/b     : (1, 1, L)           LayerNorm affine for this layer
    # out     : (1, 1, BHL, L)
    x2 = x_ref[0].reshape(B * T_SMALL, D_MODEL)                                   # (16, 32)

    # ---- head-fused Q/K projections: 2 MXU pushes instead of 8 ----
    q_flat = jnp.dot(x2, wq_ref[0, 0], preferred_element_type=jnp.float32)        # (16, H*dh)
    k_flat = jnp.dot(x2, wk_ref[0, 0], preferred_element_type=jnp.float32)

    # ---- assemble head-batched q/k (static lane slices + tiny axis-0 concat) ----
    q = jnp.concatenate(
        [q_flat[:, h * D_HEAD:(h + 1) * D_HEAD] for h in range(N_HEADS)], axis=0
    ).reshape(N_HEADS * B, T_SMALL, D_HEAD)
    k = jnp.concatenate(
        [k_flat[:, h * D_HEAD:(h + 1) * D_HEAD] for h in range(N_HEADS)], axis=0
    ).reshape(N_HEADS * B, T_SMALL, D_HEAD)

    # ---- scaled dot-product scores; rows ordered (h, b, t) ----
    s = jnp.einsum('gte,gse->gts', q, k,
                   preferred_element_type=jnp.float32) * SCALE                    # (H*B, t, t)
    s2 = s.reshape(BHT, T_SMALL)                                                  # (64, 8)

    # ---- softmax WITHOUT denominator: LayerNorm cancels any positive per-row scale ----
    ex = jnp.exp(s2 - jnp.max(s2, axis=-1, keepdims=True))                        # (64, 8)

    # ---- LayerNorm stats on the SMALL map (exact: every element repeats uniformly) ----
    mu = jnp.mean(ex, axis=-1, keepdims=True)
    var = jnp.mean(jnp.square(ex - mu), axis=-1, keepdims=True)
    nrm = (ex - mu) * lax.rsqrt(var + EPS)                                        # (64, 8)

    # ---- column upsample (K=8 dot), affine on the small map, then row expansion (K=64) ----
    small = jnp.dot(nrm, ecol_ref[0], preferred_element_type=jnp.float32)         # (64, 64)
    small = small * g_ref[0] + b_ref[0]
    out_ref[0, 0] = jnp.dot(erow_ref[0], small,
                            preferred_element_type=jnp.float32)                   # (512, 64)


# ---------------- host-side constant expansion matrices (built once at init) ---------------
def _build_expansion_constants():
    L, T = WIN, T_SMALL
    rep = L // T
    r = jnp.arange(BHL)
    b_o = r // (N_HEADS * L)
    h_o = (r // L) % N_HEADS
    i_o = r % L
    j = jnp.arange(L)
    e_rows, e_cols = [], []
    for interleave in (True, False):          # branch 0 = series (interleave), 1 = prior (tile)
        k_small = (i_o // rep) if interleave else (i_o % T)
        tgt = (h_o * B + b_o) * T + k_small                                    # small-row index
        e_rows.append((jnp.arange(BHT)[None, :] == tgt[:, None]).astype(jnp.float32))
        j_small = (j // rep) if interleave else (j % T)
        e_cols.append((jnp.arange(T)[:, None] == j_small[None, :]).astype(jnp.float32))
    return jnp.stack(e_rows), jnp.stack(e_cols)      # (2, BHL, BHT), (2, T, L)


# ---------------- pallas_call wrapper (jitted; all heavy prep already done at init) --------
@jax.jit
def _encoder_forward_jit(x_patch_size, x_patch_num, wq, wk, gam, bet, e_row, e_col):
    e_layers = wq.shape[0]
    x_stacked = jnp.stack([x_patch_size, x_patch_num])            # (2, B, T, D)

    out = pl.pallas_call(
        _encoder_fused_kernel,
        out_shape=jax.ShapeDtypeStruct((e_layers, 2, BHL, WIN), jnp.float32),
        grid=(e_layers, 2),
        in_specs=[
            pl.BlockSpec((1, B, T_SMALL, D_MODEL), lambda e, br: (br, 0, 0, 0)),
            pl.BlockSpec((1, 1, D_MODEL, N_HEADS * D_HEAD), lambda e, br: (e, br, 0, 0)),
            pl.BlockSpec((1, 1, D_MODEL, N_HEADS * D_HEAD), lambda e, br: (e, br, 0, 0)),
            pl.BlockSpec((1, BHL, BHT), lambda e, br: (br, 0, 0)),   # constant per branch
            pl.BlockSpec((1, T_SMALL, WIN), lambda e, br: (br, 0, 0)),
            pl.BlockSpec((1, 1, WIN), lambda e, br: (e, 0, 0)),
            pl.BlockSpec((1, 1, WIN), lambda e, br: (e, 0, 0)),
        ],
        out_specs=pl.BlockSpec((1, 1, BHL, WIN), lambda e, br: (e, br, 0, 0)),
        compiler_params=pltpu.CompilerParams(
            dimension_semantics=("parallel", "parallel")),
    )(x_stacked, wq, wk, e_row, e_col, gam, bet)

    out = out.reshape(e_layers, 2, B, N_HEADS, WIN, WIN)
    return out[:, 0], out[:, 1]                                    # series_all, prior_all


# ---------------- parameter init (deterministic, mirrors nn.Linear / nn.LayerNorm init) ----
def init_encoder_params(key):
    layers = []
    scale = 1.0 / math.sqrt(D_MODEL)
    for _ in range(E_LAYERS):
        key, k0, k1, k2, k3 = jax.random.split(key, 5)
        layers.append(dict(
            # attn_layer[0]: per-variant, per-head Q/K projections (transposed nn.Linear weights)
            wq_size=jax.random.normal(
                k0, (N_PATCH_VARIANTS, N_HEADS, D_MODEL, D_HEAD), jnp.float32) * scale,
            wk_size=jax.random.normal(
                k1, (N_PATCH_VARIANTS, N_HEADS, D_MODEL, D_HEAD), jnp.float32) * scale,
            wq_num=jax.random.normal(
                k2, (N_PATCH_VARIANTS, N_HEADS, D_MODEL, D_HEAD), jnp.float32) * scale,
            wk_num=jax.random.normal(
                k3, (N_PATCH_VARIANTS, N_HEADS, D_MODEL, D_HEAD), jnp.float32) * scale,
            # attn_layer[1]: LayerNorm(WIN) affine params (PyTorch init: ones / zeros)
            gamma=jnp.ones((1, WIN), jnp.float32),
            beta=jnp.zeros((1, WIN), jnp.float32),
        ))

    # ---- pre-fuse heads and pre-stack across layers/branches at INIT time (not per call) ----
    def fuse(w):                               # (H, D, dh) -> (D, H*dh), columns ordered (h, dh)
        return jnp.transpose(w, (1, 0, 2)).reshape(D_MODEL, N_HEADS * D_HEAD)

    prepared = {}
    for v in range(N_PATCH_VARIANTS):
        wq = jnp.stack([jnp.stack([fuse(l["wq_size"][v]), fuse(l["wq_num"][v])])
                        for l in layers])      # (E, 2, D, H*dh) ; branch 0=series, 1=prior
        wk = jnp.stack([jnp.stack([fuse(l["wk_size"][v]), fuse(l["wk_num"][v])])
                        for l in layers])
        prepared[v] = (wq, wk)

    gam = jnp.stack([l["gamma"] for l in layers])          # (E, 1, L)
    bet = jnp.stack([l["beta"] for l in layers])
    e_row, e_col = _build_expansion_constants()

    return dict(layers=layers, prepared=prepared, gamma=gam, beta=bet,
                e_row=e_row, e_col=e_col)


# ---------------- Encoder forward (mirrors the reference control flow) ---------------------
def encoder_forward(params, x_patch_size, x_patch_num, x_ori, patch_index, attn_mask=None):
    # TODO(synk): attn_mask path of the reference attention layer is unspecified; only
    # attn_mask=None (the value used by the reference model) is supported.
    assert attn_mask is None
    assert x_ori.shape[1] == WIN        # x_ori fixes the full window length of the maps
    # TODO(synk): patch_index must be a static Python int (it selects a weight variant
    # before the jit boundary); a traced value would need a PrefetchScalarGridSpec index_map.
    assert isinstance(patch_index, int)

    wq, wk = params["prepared"][patch_index]
    series_all, prior_all = _encoder_forward_jit(
        x_patch_size, x_patch_num, wq, wk,
        params["gamma"], params["beta"], params["e_row"], params["e_col"])

    # NOTE: the reference Encoder stores self.norm but never applies it in forward().
    series_list = [series_all[e] for e in range(series_all.shape[0])]
    prior_list = [prior_all[e] for e in range(prior_all.shape[0])]
    return series_list, prior_list


if __name__ == "__main__":
    key = jax.random.PRNGKey(0)
    k1, k2, k3 = jax.random.split(key, 3)
    x_patch_size = jax.random.normal(k1, (B, N_PATCH, D_MODEL), jnp.float32)
    x_patch_num = jax.random.normal(k2, (B, PATCH, D_MODEL), jnp.float32)
    x_ori = jax.random.normal(k3, (B, WIN, D_MODEL), jnp.float32)

    params = init_encoder_params(jax.random.PRNGKey(42))

    series_list, prior_list = encoder_forward(
        params, x_patch_size, x_patch_num, x_ori, patch_index=0, attn_mask=None)

    jax.block_until_ready(series_list)
    jax.block_until_ready(prior_list)

    assert len(series_list) == E_LAYERS and len(prior_list) == E_LAYERS
    for s, p in zip(series_list, prior_list):
        assert s.shape == (B, N_HEADS, WIN, WIN)
        assert p.shape == (B, N_HEADS, WIN, WIN)
        assert bool(jnp.all(jnp.isfinite(s))) and bool(jnp.all(jnp.isfinite(p)))

    print("KERNEL_OK")
</pallas_src>

<mosaic_0001>
module attributes {stable_mosaic.version = 11 : i64} {
  func.func @_encoder_fused_kernel(%arg0: i32, %arg1: i32, %arg2: memref<1x2x8x32xf32, #tpu.memory_space<vmem>>, %arg3: memref<1x1x32x32xf32, #tpu.memory_space<vmem>>, %arg4: memref<1x1x32x32xf32, #tpu.memory_space<vmem>>, %arg5: memref<1x512x64xf32, #tpu.memory_space<vmem>>, %arg6: memref<1x8x64xf32, #tpu.memory_space<vmem>>, %arg7: memref<1x1x64xf32, #tpu.memory_space<vmem>>, %arg8: memref<1x1x64xf32, #tpu.memory_space<vmem>>, %arg9: memref<1x1x512x64xf32, #tpu.memory_space<vmem>>) attributes {dimension_semantics = [#tpu.dimension_semantics<parallel>, #tpu.dimension_semantics<parallel>], iteration_bounds = array<i64: 2, 2>, scalar_prefetch = 0 : i64, scratch_operands = 0 : i64, tpu.core_type = #tpu.core_type<tc>, window_params = [{transform_indices = @transform_0, window_bounds = array<i64: 1, 2, 8, 32>}, {transform_indices = @transform_1, window_bounds = array<i64: 1, 1, 32, 32>}, {transform_indices = @transform_2, window_bounds = array<i64: 1, 1, 32, 32>}, {transform_indices = @transform_3, window_bounds = array<i64: 1, 512, 64>}, {transform_indices = @transform_4, window_bounds = array<i64: 1, 8, 64>}, {transform_indices = @transform_5, window_bounds = array<i64: 1, 1, 64>}, {transform_indices = @transform_6, window_bounds = array<i64: 1, 1, 64>}, {transform_indices = @transform_7, window_bounds = array<i64: 1, 1, 512, 64>}]} {
    %c0 = arith.constant 0 : index
    %c0_0 = arith.constant 0 : index
    %c0_1 = arith.constant 0 : index
    %c0_2 = arith.constant 0 : index
    %0 = vector.load %arg2[%c0, %c0_0, %c0_1, %c0_2] : memref<1x2x8x32xf32, #tpu.memory_space<vmem>>, vector<1x2x8x32xf32>
    %1 = vector.shape_cast %0 : vector<1x2x8x32xf32> to vector<2x8x32xf32>
    %2 = vector.shape_cast %1 : vector<2x8x32xf32> to vector<16x32xf32>
    %c0_3 = arith.constant 0 : index
    %c0_4 = arith.constant 0 : index
    %c0_5 = arith.constant 0 : index
    %c0_6 = arith.constant 0 : index
    %3 = vector.load %arg3[%c0_3, %c0_4, %c0_5, %c0_6] : memref<1x1x32x32xf32, #tpu.memory_space<vmem>>, vector<1x1x32x32xf32>
    %4 = vector.shape_cast %3 : vector<1x1x32x32xf32> to vector<32x32xf32>
    %cst = arith.constant dense<0.000000e+00> : vector<16x32xf32>
    %5 = tpu.matmul %2, %4, %cst {dimension_numbers = #tpu.dot_dimension_numbers<[1], [0], [0], [1], [0, 0, 1, 1], [], []>} : vector<16x32xf32>, vector<32x32xf32>, vector<16x32xf32> -> vector<16x32xf32>
    %c0_7 = arith.constant 0 : index
    %c0_8 = arith.constant 0 : index
    %c0_9 = arith.constant 0 : index
    %c0_10 = arith.constant 0 : index
    %6 = vector.load %arg4[%c0_7, %c0_8, %c0_9, %c0_10] : memref<1x1x32x32xf32, #tpu.memory_space<vmem>>, vector<1x1x32x32xf32>
    %7 = vector.shape_cast %6 : vector<1x1x32x32xf32> to vector<32x32xf32>
    %cst_11 = arith.constant dense<0.000000e+00> : vector<16x32xf32>
    %8 = tpu.matmul %2, %7, %cst_11 {dimension_numbers = #tpu.dot_dimension_numbers<[1], [0], [0], [1], [0, 0, 1, 1], [], []>} : vector<16x32xf32>, vector<32x32xf32>, vector<16x32xf32> -> vector<16x32xf32>
    %9 = vector.extract_strided_slice %5 {offsets = [0, 0], sizes = [16, 8], strides = [1, 1]} : vector<16x32xf32> to vector<16x8xf32>
    %10 = vector.extract_strided_slice %5 {offsets = [0, 8], sizes = [16, 8], strides = [1, 1]} : vector<16x32xf32> to vector<16x8xf32>
    %11 = vector.extract_strided_slice %5 {offsets = [0, 16], sizes = [16, 8], strides = [1, 1]} : vector<16x32xf32> to vector<16x8xf32>
    %12 = vector.extract_strided_slice %5 {offsets = [0, 24], sizes = [16, 8], strides = [1, 1]} : vector<16x32xf32> to vector<16x8xf32>
    %13 = tpu.concatenate %9, %10, %11, %12 in 0 : vector<16x8xf32>, vector<16x8xf32>, vector<16x8xf32>, vector<16x8xf32> -> vector<64x8xf32>
    %14 = vector.shape_cast %13 : vector<64x8xf32> to vector<8x8x8xf32>
    %15 = vector.extract_strided_slice %8 {offsets = [0, 0], sizes = [16, 8], strides = [1, 1]} : vector<16x32xf32> to vector<16x8xf32>
    %16 = vector.extract_strided_slice %8 {offsets = [0, 8], sizes = [16, 8], strides = [1, 1]} : vector<16x32xf32> to vector<16x8xf32>
    %17 = vector.extract_strided_slice %8 {offsets = [0, 16], sizes = [16, 8], strides = [1, 1]} : vector<16x32xf32> to vector<16x8xf32>
    %18 = vector.extract_strided_slice %8 {offsets = [0, 24], sizes = [16, 8], strides = [1, 1]} : vector<16x32xf32> to vector<16x8xf32>
    %19 = tpu.concatenate %15, %16, %17, %18 in 0 : vector<16x8xf32>, vector<16x8xf32>, vector<16x8xf32>, vector<16x8xf32> -> vector<64x8xf32>
    %20 = vector.shape_cast %19 : vector<64x8xf32> to vector<8x8x8xf32>
    "tpu.trace_start"() <{level = 10 : i32, message = "gte,gse->gts"}> : () -> ()
    %cst_12 = arith.constant dense<0.000000e+00> : vector<8x8x8xf32>
    %21 = tpu.matmul %14, %20, %cst_12 {dimension_numbers = #tpu.dot_dimension_numbers<[2], [2], [1], [1], [0, 0, 0, 1, 1, 1], [0], [0]>} : vector<8x8x8xf32>, vector<8x8x8xf32>, vector<8x8x8xf32> -> vector<8x8x8xf32>
    "tpu.trace_stop"() : () -> ()
    %cst_13 = arith.constant 0.353553385 : f32
    %22 = vector.broadcast %cst_13 : f32 to vector<8x8x8xf32>
    %23 = arith.mulf %21, %22 : vector<8x8x8xf32>
    %24 = vector.shape_cast %23 : vector<8x8x8xf32> to vector<64x8xf32>
    %cst_14 = arith.constant dense<0xFF800000> : vector<64xf32>
    %25 = vector.multi_reduction <maximumf>, %24, %cst_14 [1] : vector<64x8xf32> to vector<64xf32>
    %26 = vector.shape_cast %25 : vector<64xf32> to vector<64x1xf32>
    %27 = vector.broadcast %26 : vector<64x1xf32> to vector<64x8xf32>
    %28 = arith.subf %24, %27 : vector<64x8xf32>
    %29 = math.exp %28 : vector<64x8xf32>
    %cst_15 = arith.constant dense<0.000000e+00> : vector<64xf32>
    %30 = vector.multi_reduction <add>, %29, %cst_15 [1] : vector<64x8xf32> to vector<64xf32>
    %31 = vector.shape_cast %30 : vector<64xf32> to vector<64x1xf32>
    %cst_16 = arith.constant 8.000000e+00 : f32
    %32 = vector.broadcast %cst_16 : f32 to vector<64x1xf32>
    %33 = arith.divf %31, %32 : vector<64x1xf32>
    %34 = vector.broadcast %33 : vector<64x1xf32> to vector<64x8xf32>
    %35 = arith.subf %29, %34 : vector<64x8xf32>
    %36 = arith.mulf %35, %35 : vector<64x8xf32>
    %cst_17 = arith.constant dense<0.000000e+00> : vector<64xf32>
    %37 = vector.multi_reduction <add>, %36, %cst_17 [1] : vector<64x8xf32> to vector<64xf32>
    %38 = vector.shape_cast %37 : vector<64xf32> to vector<64x1xf32>
    %cst_18 = arith.constant 8.000000e+00 : f32
    %39 = vector.broadcast %cst_18 : f32 to vector<64x1xf32>
    %40 = arith.divf %38, %39 : vector<64x1xf32>
    %41 = vector.broadcast %33 : vector<64x1xf32> to vector<64x8xf32>
    %42 = arith.subf %29, %41 : vector<64x8xf32>
    %cst_19 = arith.constant 9.99999974E-6 : f32
    %43 = vector.broadcast %cst_19 : f32 to vector<64x1xf32>
    %44 = arith.addf %40, %43 : vector<64x1xf32>
    %45 = math.rsqrt %44 : vector<64x1xf32>
    %46 = vector.broadcast %45 : vector<64x1xf32> to vector<64x8xf32>
    %47 = arith.mulf %42, %46 : vector<64x8xf32>
    %c0_20 = arith.constant 0 : index
    %c0_21 = arith.constant 0 : index
    %c0_22 = arith.constant 0 : index
    %48 = vector.load %arg6[%c0_20, %c0_21, %c0_22] : memref<1x8x64xf32, #tpu.memory_space<vmem>>, vector<1x8x64xf32>
    %49 = vector.shape_cast %48 : vector<1x8x64xf32> to vector<8x64xf32>
    %cst_23 = arith.constant dense<0.000000e+00> : vector<64x64xf32>
    %50 = tpu.matmul %47, %49, %cst_23 {dimension_numbers = #tpu.dot_dimension_numbers<[1], [0], [0], [1], [0, 0, 1, 1], [], []>} : vector<64x8xf32>, vector<8x64xf32>, vector<64x64xf32> -> vector<64x64xf32>
    %c0_24 = arith.constant 0 : index
    %c0_25 = arith.constant 0 : index
    %c0_26 = arith.constant 0 : index
    %51 = vector.load %arg7[%c0_24, %c0_25, %c0_26] : memref<1x1x64xf32, #tpu.memory_space<vmem>>, vector<1x1x64xf32>
    %52 = vector.shape_cast %51 : vector<1x1x64xf32> to vector<1x64xf32>
    %53 = vector.broadcast %52 : vector<1x64xf32> to vector<64x64xf32>
    %54 = arith.mulf %50, %53 : vector<64x64xf32>
    %c0_27 = arith.constant 0 : index
    %c0_28 = arith.constant 0 : index
    %c0_29 = arith.constant 0 : index
    %55 = vector.load %arg8[%c0_27, %c0_28, %c0_29] : memref<1x1x64xf32, #tpu.memory_space<vmem>>, vector<1x1x64xf32>
    %56 = vector.shape_cast %55 : vector<1x1x64xf32> to vector<1x64xf32>
    %57 = vector.broadcast %56 : vector<1x64xf32> to vector<64x64xf32>
    %58 = arith.addf %54, %57 : vector<64x64xf32>
    %c0_30 = arith.constant 0 : index
    %c0_31 = arith.constant 0 : index
    %c0_32 = arith.constant 0 : index
    %59 = vector.load %arg5[%c0_30, %c0_31, %c0_32] : memref<1x512x64xf32, #tpu.memory_space<vmem>>, vector<1x512x64xf32>
    %60 = vector.shape_cast %59 : vector<1x512x64xf32> to vector<512x64xf32>
    %cst_33 = arith.constant dense<0.000000e+00> : vector<512x64xf32>
    %61 = tpu.matmul %60, %58, %cst_33 {dimension_numbers = #tpu.dot_dimension_numbers<[1], [0], [0], [1], [0, 0, 1, 1], [], []>} : vector<512x64xf32>, vector<64x64xf32>, vector<512x64xf32> -> vector<512x64xf32>
    %c0_34 = arith.constant 0 : index
    %c0_35 = arith.constant 0 : index
    %c0_36 = arith.constant 0 : index
    %c0_37 = arith.constant 0 : index
    %62 = vector.load %arg9[%c0_34, %c0_35, %c0_36, %c0_37] : memref<1x1x512x64xf32, #tpu.memory_space<vmem>>, vector<1x1x512x64xf32>
    %63 = vector.shape_cast %62 : vector<1x1x512x64xf32> to vector<512x64xf32>
    %64 = vector.shape_cast %61 : vector<512x64xf32> to vector<1x1x512x64xf32>
    tpu.vector_store %arg9[%c0_34, %c0_35, %c0_36, %c0_37], %64 {strides = array<i32>} : memref<1x1x512x64xf32, #tpu.memory_space<vmem>>, vector<1x1x512x64xf32>,
    return
  }
  func.func @transform_0(%arg0: i32, %arg1: i32) -> (i32, i32, i32, i32) {
    %c0_i32 = arith.constant 0 : i32
    %c0_i32_0 = arith.constant 0 : i32
    %c0_i32_1 = arith.constant 0 : i32
    %c0_i32_2 = arith.constant 0 : i32
    return %arg1, %c0_i32, %c0_i32_0, %c0_i32_1 : i32, i32, i32, i32
  }
  func.func @transform_1(%arg0: i32, %arg1: i32) -> (i32, i32, i32, i32) {
    %c0_i32 = arith.constant 0 : i32
    %c0_i32_0 = arith.constant 0 : i32
    %c0_i32_1 = arith.constant 0 : i32
    return %arg0, %arg1, %c0_i32, %c0_i32_0 : i32, i32, i32, i32
  }
  func.func @transform_2(%arg0: i32, %arg1: i32) -> (i32, i32, i32, i32) {
    %c0_i32 = arith.constant 0 : i32
    %c0_i32_0 = arith.constant 0 : i32
    %c0_i32_1 = arith.constant 0 : i32
    return %arg0, %arg1, %c0_i32, %c0_i32_0 : i32, i32, i32, i32
  }
  func.func @transform_3(%arg0: i32, %arg1: i32) -> (i32, i32, i32) {
    %c0_i32 = arith.constant 0 : i32
    %c0_i32_0 = arith.constant 0 : i32
    %c0_i32_1 = arith.constant 0 : i32
    return %arg1, %c0_i32, %c0_i32_0 : i32, i32, i32
  }
  func.func @transform_4(%arg0: i32, %arg1: i32) -> (i32, i32, i32) {
    %c0_i32 = arith.constant 0 : i32
    %c0_i32_0 = arith.constant 0 : i32
    %c0_i32_1 = arith.constant 0 : i32
    return %arg1, %c0_i32, %c0_i32_0 : i32, i32, i32
  }
  func.func @transform_5(%arg0: i32, %arg1: i32) -> (i32, i32, i32) {
    %c0_i32 = arith.constant 0 : i32
    %c0_i32_0 = arith.constant 0 : i32
    %c0_i32_1 = arith.constant 0 : i32
    return %arg0, %c0_i32, %c0_i32_0 : i32, i32, i32
  }
  func.func @transform_6(%arg0: i32, %arg1: i32) -> (i32, i32, i32) {
    %c0_i32 = arith.constant 0 : i32
    %c0_i32_0 = arith.constant 0 : i32
    %c0_i32_1 = arith.constant 0 : i32
    return %arg0, %c0_i32, %c0_i32_0 : i32, i32, i32
  }
  func.func @transform_7(%arg0: i32, %arg1: i32) -> (i32, i32, i32, i32) {
    %c0_i32 = arith.constant 0 : i32
    %c0_i32_0 = arith.constant 0 : i32
    %c0_i32_1 = arith.constant 0 : i32
    return %arg0, %arg1, %c0_i32, %c0_i32_0 : i32, i32, i32, i32
  }
}

</mosaic_0001>

<bundles_post_ra>
// kernel: _encoder_forward_jit.1
= control target key start
LH: loop header
LB: loop body
LE: loop exit
PB: predicated region body
PF: predicated region fallthrough
CT: control target
= control target key end

     0   :  { %s3035_s24 = smov 0   ;;  %s3037_s25 = smov 0   ;;  %s3453_s0 = inlined_call_operand.vmem [shape: f32[2,2,8,32], index: 0, kind: input, shape index: {}]   ;;  %s3454_s1 = inlined_call_operand.vmem [shape: f32[2,2,32,32], index: 1, kind: input, shape index: {}]   ;;  %s3455_s2 = inlined_call_operand.vmem [shape: f32[2,2,32,32], index: 2, kind: input, shape index: {}]   ;;  %s3456_s3 = inlined_call_operand.vmem [shape: f32[2,512,64], index: 3, kind: input, shape index: {}]   ;;  %s3457_s4 = inlined_call_operand.vmem [shape: f32[2,8,64], index: 4, kind: input, shape index: {}]   ;;  %s3458_s5 = inlined_call_operand.vmem [shape: f32[2,1,64], index: 5, kind: input, shape index: {}]   ;;  %s3459_s6 = inlined_call_operand.vmem [shape: f32[2,1,64], index: 6, kind: input, shape index: {}]   ;;  %s3460_s7 = inlined_call_operand.vmem [shape: f32[2,2,512,64], index: 7, kind: output, shape index: {}]  }
   0x1   :  { %s3039_s26 = smov 0   ;;  %s3041_s27 = smov 0  }
   0x2   :  { %s3043_s28 = smov 0  }
   0x3 LB: > { %s26_s29 = sadd.s32 1, %s2980_s26  ;;  %s29_s30 = sadd.s32 1, %s2984_s27  ;;  %s2988_s28 = sphi %s3043_s28, %s17_s28   ;;  %s2984_s27 = sphi %s3041_s27, %s3464_s27   ;;  %s2980_s26 = sphi %s3039_s26, %s3463_s26   ;;  %s2976_s25 = sphi %s3037_s25, %s3462_s25   ;;  %s2972_s24 = sphi %s3035_s24, %s3461_s24  }
   0x4   : > { %p27_p0 = scmp.ge.s32.totalorder %s26_s29, 2  ;;  %p2423_p1 = scmp.ge.s32.totalorder %s2988_s28, 1 }
   0x5   : > { %p318_p2 = scmp.lt.s32.totalorder %s2988_s28, 5 }
   0x6   : > { %s3466_s29 = smov (%p27_p0, %s26_s29), 0  ;;  %s3468_s30 = smov (!%p27_p0, %s29_s30), %s2984_s27 }
   0x7   : > { %p319_p3 = pnand %p2423_p1, %p318_p2  ;;  %p31_p4 = scmp.ge.s32.totalorder %s3468_s30, 2 }
   0x8   : > { %p387_p5 = scmp.lt.s32.totalorder (!%p319_p3), %s2972_s24, 1  ;;  %p392_p6 = scmp.lt.s32.totalorder (!%p319_p3), %s2976_s25, 1  ;;  %vm440_vm0 = vcmask (!%p319_p3), 261120   ;;  %v2990_v14 = vmov (!%p319_p3), 0.0   ;;  %vm2991_vm1 = vmmov (!%p319_p3), 0   ;;  %vm629_vm2 = vcmask (!%p319_p3), 64512  }
   0x9   : > { %s3470_s30 = smov (%p31_p4, %s3468_s30), 0  ;;  %322 = sbr.rel (%p319_p3) target bundleno = 1563 (0x61b), region = 48 }
   0xa   : > { %s2992_s22 = smov (!%p319_p3), 120   ;;  %s2993_s23 = smov (!%p319_p3), 112   ;;  %vm1607_vm3 = vcmask (!%p319_p3), 523264  }
  0x10   : > { %s3472_s24 = smov (!%p387_p5, %s2972_s24), 1  ;;  %s3474_s25 = smov (!%p392_p6, %s2976_s25), 1 }
  0x11   : > { %s2426_s8 = sshll.u32 %s3472_s24, 2  ;;  %s2427_s9 = sshll.u32 %s3474_s25, 3 }
  0x12   : > { %s398_s10 = sadd.s32 %s2427_s9, %s2426_s8  ;;  %s2534_s18 = sshll.u32 %s3472_s24, 4 }
  0x13   : > { %s2428_s11 = sshll.u32 %s398_s10, 3  ;;  %s391_s21 = scalar_lea.vmem %s3453_s0, %s2534_s18 }
  0x14   : > { %s400_s14 = scalar_lea.vmem %s3454_s1, %s2428_s11  ;;  %s409_s17 = scalar_lea.vmem %s3455_s2, %s2428_s11  ;;  %v434_v12 = vld [vmem:[%s391_s21] sm:$0xff]  ;;  %v435_v13 = vld [vmem:[%s391_s21 + $0x8] sm:$0xff] }
  0x15   : > { %v436_v0 = vld [vmem:[%s400_s14] sm:$0xff]  ;;  %v437_v1 = vld [vmem:[%s400_s14 + $0x8] sm:$0xff]  ;;  %v438_v2 = vld [vmem:[%s400_s14 + $0x10] sm:$0xff]  ;;  %2653 = vmatprep.mubr.msk.f32.mxu0 %vm440_vm0, %v434_v12  ;;  %2664 = vmatprep.mubr.msk.f32.mxu1 %vm440_vm0, %v434_v12  ;;  %s2994_s8 = smov 104   ;;  %s2434_s9 = sshll.u32 %s3472_s24, 3 }
  0x16   : > { %v2833_v3 = vpack.c.bf16 %v437_v1, %v436_v0  ;;  %v522_v4 = vld [vmem:[%s409_s17] sm:$0xff]  ;;  %v523_v5 = vld [vmem:[%s409_s17 + $0x8] sm:$0xff]  ;;  %v439_v6 = vld [vmem:[%s400_s14 + $0x18] sm:$0xff]  ;;  %s418_s12 = scalar_lea.vmem %s3457_s4, %s2434_s9  ;;  %s421_s15 = scalar_lea.vmem %s3458_s5, %s3474_s25 }
  0x17   : > { %v2841_v7 = vpack.c.bf16 %v523_v5, %v522_v4  ;;  %v2837_v8 = vpack.c.bf16 %v439_v6, %v438_v2  ;;  %v524_v9 = vld [vmem:[%s409_s17 + $0x10] sm:$0xff]  ;;  %v525_v10 = vld [vmem:[%s409_s17 + $0x18] sm:$0xff]  ;;  %s424_s18 = scalar_lea.vmem %s3459_s6, %s3474_s25  ;;  %s2535_s19 = sshll.u32 %s3472_s24, 9 }
  0x18   : > { %2834 = vmatprep.subr.bf16.mxu0 %v2833_v3  ;;  %v2845_v11 = vpack.c.bf16 %v525_v10, %v524_v9 }
  0x19   : > { %2842 = vmatprep.subr.bf16.mxu1 %v2841_v7  ;;  %2836 = vmatpush3.bf16.msra.mxu0 %v2833_v3 }
  0x1a   : > { %2844 = vmatpush3.bf16.msra.mxu1 %v2841_v7  ;;  %2838 = vmatprep.subr.bf16.mxu0 %v2837_v8 }
  0x1b   : > { %2846 = vmatprep.subr.bf16.mxu1 %v2845_v11 }
  0x1d   : > { %2840 = vmatpush3.bf16.msra.mxu0 %v2837_v8 }
  0x1e   : > { %2848 = vmatpush3.bf16.msra.mxu1 %v2845_v11  ;;  %2667 = vmatprep.subr.mxu0 %v2990_v14 }
  0x1f   : > { %2672 = vmatprep.subr.mxu1 %v2990_v14 }
  0x20   : > { %2654 = vmatmul.mubr.msk.f32.vlgmr.msra.gmra.mrb[0].mxu0 %vm440_vm0, %v435_v13 }
  0x21   : > { %2665 = vmatmul.mubr.msk.f32.vlgmr.msra.gmra.mrb[0].mxu1 %vm440_vm0, %v435_v13  ;;  %2669 = vmatprep.mubr.msk.f32.mxu0 %vm2991_vm1, %v2990_v14 }
  0x22   : > { %2674 = vmatprep.mubr.msk.f32.mxu1 %vm2991_vm1, %v2990_v14 }
  0xf3   : > { %v2655_v15 = vpop.f32.mrb[0].mxu0 }
  0xf4   : > { %v2666_v16 = vpop.f32.mrb[0].mxu1  ;;  %605 = vrot.lane.b32.xlu1 %v2655_v15, %s2992_s22  ;;  %v513_v17 = vpop.f32.mrb[1].mxu0 }
  0xf5   : > { %619 = vrot.lane.b32.xlu0 %v2666_v16, %s2992_s22  ;;  %v592_v18 = vpop.f32.mrb[1].mxu1  ;;  %2673 = vmatpush3.xpose.msk.msra.mxu1 %vm629_vm2, %v2666_v16 }
  0xf6   : > { %2668 = vmatpush3.xpose.msk.msra.mxu0 %vm629_vm2, %v592_v18  ;;  %2682 = vmatprep.subr.mxu1 %v2990_v14 }
  0xf7   : > { %2677 = vmatprep.subr.mxu0 %v2990_v14 }
  0xf8   : > { %2675 = vmatmul.mubr.msk.f32.vlgmr.msra.gmra.mrb[2].mxu1 %vm629_vm2, %v2655_v15  ;;  %623 = vrot.lane.b32.xlu1 %v2666_v16, %s2993_s23 }
  0xf9   : > { %617 = vrot.lane.b32.xlu0 %v592_v18, %s2992_s22  ;;  %2670 = vmatmul.mubr.msk.f32.vlgmr.msra.gmra.mrb[2].mxu0 %vm629_vm2, %v513_v17 }
  0xfa   : > { %2684 = vmatprep.mubr.msk.f32.mxu1 %vm2991_vm1, %v2990_v14  ;;  %2679 = vmatprep.mubr.msk.f32.mxu0 %vm2991_vm1, %v2990_v14 }
  0xfc   : > { %603 = vrot.lane.b32.xlu1 %v513_v17, %s2992_s22  ;;  %s3173_s22 = scalar_lea.vmem %s3456_s3, %s2535_s19 }
  0xfd   : > { %621 = vrot.lane.b32.xlu0 %v592_v18, %s2993_s23 }
 0x100   : > { %609 = vrot.lane.b32.xlu1 %v2655_v15, %s2993_s23 }
 0x101   : > { %607 = vrot.lane.b32.xlu0 %v513_v17, %s2993_s23  ;;  %s2435_s23 = sshll.u32 %s3472_s24, 6 }
 0x104   : > { %627 = vrot.lane.b32.xlu1 %v2666_v16, %s2994_s8 }
 0x105   : > { %625 = vrot.lane.b32.xlu0 %v592_v18, %s2994_s8 }
 0x108   : > { %613 = vrot.lane.b32.xlu1 %v2655_v15, %s2994_s8 }
 0x109   : > { %611 = vrot.lane.b32.xlu0 %v513_v17, %s2994_s8  ;;  %s2436_s8 = sshll.u32 %s3474_s25, 7 }
 0x10a   : > { %s431_s9 = sadd.s32 %s2436_s8, %s2435_s23 }
 0x10b   : > { %s2437_s10 = sshll.u32 %s431_s9, 3 }
 0x10c   : > { %s3308_s13 = scalar_lea.vmem %s3460_s7, %s2437_s10 }
 0x166   : > { %v606_v19 = vpop.permute.xlu1 %605 }
 0x167   : > { %v620_v20 = vpop.permute.xlu0 %619 }
 0x168   : > { %2683 = vmatpush3.xpose.msk.msra.mxu1 %vm629_vm2, %v620_v20 }
 0x169   : > { %2692 = vmatprep.subr.mxu1 %v2990_v14 }
 0x16a   : > { %v624_v21 = vpop.permute.xlu1 %623 }
 0x16b   : > { %v618_v22 = vpop.permute.xlu0 %617  ;;  %2685 = vmatmul.mubr.msk.f32.vlgmr.msra.gmra.mrb[4].mxu1 %vm629_vm2, %v606_v19 }
 0x16c   : > { %2678 = vmatpush3.xpose.msk.msra.mxu0 %vm629_vm2, %v618_v22  ;;  %2693 = vmatpush3.xpose.msk.msra.mxu1 %vm629_vm2, %v624_v21 }
 0x16d   : > { %2687 = vmatprep.subr.mxu0 %v2990_v14  ;;  %2694 = vmatprep.mubr.msk.f32.mxu1 %vm2991_vm1, %v2990_v14 }
 0x16e   : > { %v604_v23 = vpop.permute.xlu1 %603  ;;  %2702 = vmatprep.subr.mxu1 %v2990_v14 }
 0x16f   : > { %v622_v24 = vpop.permute.xlu0 %621  ;;  %2680 = vmatmul.mubr.msk.f32.vlgmr.msra.gmra.mrb[4].mxu0 %vm629_vm2, %v604_v23 }
 0x170   : > { %2688 = vmatpush3.xpose.msk.msra.mxu0 %vm629_vm2, %v622_v24  ;;  %2689 = vmatprep.mubr.msk.f32.mxu0 %vm2991_vm1, %v2990_v14 }
 0x171   : > { %2697 = vmatprep.subr.mxu0 %v2990_v14 }
 0x172   : > { %v610_v25 = vpop.permute.xlu1 %609 }
 0x173   : > { %v608_v26 = vpop.permute.xlu0 %607  ;;  %2695 = vmatmul.mubr.msk.f32.vlgmr.msra.gmra.mrb[6].mxu1 %vm629_vm2, %v610_v25 }
 0x174   : > { %2690 = vmatmul.mubr.msk.f32.vlgmr.msra.gmra.mrb[6].mxu0 %vm629_vm2, %v608_v26  ;;  %2704 = vmatprep.mubr.msk.f32.mxu1 %vm2991_vm1, %v2990_v14 }
 0x175   : > { %2699 = vmatprep.mubr.msk.f32.mxu0 %vm2991_vm1, %v2990_v14 }
 0x176   : > { %v628_v27 = vpop.permute.xlu1 %627 }
 0x177   : > { %v626_v28 = vpop.permute.xlu0 %625  ;;  %2703 = vmatpush3.xpose.msk.msra.mxu1 %vm629_vm2, %v628_v27 }
 0x178   : > { %2698 = vmatpush3.xpose.msk.msra.mxu0 %vm629_vm2, %v626_v28 }
 0x17a   : > { %v614_v29 = vpop.permute.xlu1 %613 }
 0x17b   : > { %v612_v30 = vpop.permute.xlu0 %611  ;;  %2705 = vmatmul.mubr.msk.f32.vlgmr.msra.gmra.mrb[8].mxu1 %vm629_vm2, %v614_v29 }
 0x17c   : > { %2700 = vmatmul.mubr.msk.f32.vlgmr.msra.gmra.mrb[8].mxu0 %vm629_vm2, %v612_v30 }
 0x1cb   : > { %v774_v31 = vpop.f32.mrb[2].mxu1 }
 0x1cc   : > { %v1223_v32 = vmul.f32 0.35355338, %v774_v31  ;;  %v700_v33 = vpop.f32.mrb[2].mxu0  ;;  %v2676_v34 = vpop.f32.mrb[3].mxu1 }
 0x1cd   : > { %v1222_v35 = vmul.f32 0.35355338, %v700_v33  ;;  %v2671_v36 = vpop.f32.mrb[3].mxu0 }
 0x1ce   : > { %v1233_v37 = vsel %vm629_vm2, %v1223_v32, -inf }
 0x1cf   : > { %1234 = vmax.xlane.f32.xlu1 %v1233_v37  ;;  %v1230_v38 = vsel %vm629_vm2, %v1222_v35, -inf }
 0x1d0   : > { %1231 = vmax.xlane.f32.xlu0 %v1230_v38 }
 0x23e   : > { %v922_v39 = vpop.f32.mrb[4].mxu1 }
 0x23f   : > { %v2686_v40 = vpop.f32.mrb[5].mxu1  ;;  %v1225_v44 = vmul.f32 0.35355338, %v922_v39 }
 0x241   : > { %v1239_v52 = vsel %vm629_vm2, %v1225_v44, -inf }
 0x242   : > { %v848_v41 = vpop.f32.mrb[4].mxu0 }
 0x243   : > { %v1224_v42 = vmul.f32 0.35355338, %v848_v41  ;;  %v2681_v43 = vpop.f32.mrb[5].mxu0 }
 0x245   : > { %v1236_v45 = vsel %vm629_vm2, %v1224_v42, -inf }
 0x246   : > { %v1070_v46 = vpop.f32.mrb[6].mxu1  ;;  %1237 = vmax.xlane.f32.xlu0 %v1236_v45 }
 0x247   : > { %v996_v47 = vpop.f32.mrb[6].mxu0  ;;  %v2696_v48 = vpop.f32.mrb[7].mxu1  ;;  %v1227_v51 = vmul.f32 0.35355338, %v1070_v46 }
 0x248   : > { %v1226_v49 = vmul.f32 0.35355338, %v996_v47  ;;  %v2691_v50 = vpop.f32.mrb[7].mxu0 }
 0x249   : > { %v1245_v54 = vsel %vm629_vm2, %v1227_v51, -inf }
 0x24a   : > { %1240 = vmax.xlane.f32.xlu0 %v1239_v52  ;;  %v1242_v53 = vsel %vm629_vm2, %v1226_v49, -inf }
 0x24b   : > { %1243 = vmax.xlane.f32.xlu1 %v1242_v53 }
 0x24e   : > { %v1218_v55 = vpop.f32.mrb[8].mxu1  ;;  %1246 = vmax.xlane.f32.xlu0 %v1245_v54 }
 0x24f   : > { %v1229_v56 = vmul.f32 0.35355338, %v1218_v55  ;;  %v1144_v57 = vpop.f32.mrb[8].mxu0  ;;  %v2706_v58 = vpop.f32.mrb[9].mxu1 }
 0x250   : > { %v1228_v59 = vmul.f32 0.35355338, %v1144_v57  ;;  %v2701_v60 = vpop.f32.mrb[9].mxu0 }
 0x251   : > { %v1251_v61 = vsel %vm629_vm2, %v1229_v56, -inf }
 0x252   : > { %1252 = vmax.xlane.f32.xlu0 %v1251_v61  ;;  %v1248_v62 = vsel %vm629_vm2, %v1228_v59, -inf }
 0x253   : > { %1249 = vmax.xlane.f32.xlu1 %v1248_v62 }
 0x25c   : > { %v1235_v63 = vpop.xlane.xlu1 %1234 }
 0x25d   : > { %v1255_v0 = vsub.f32 %v1223_v32, %v1235_v63  ;;  %v1232_v1 = vpop.xlane.xlu0 %1231 }
 0x25e   : > { %v1254_v2 = vsub.f32 %v1222_v35, %v1232_v1 }
 0x25f   : > { %v1264_v3 = vmul.f32 1.442695, %v1255_v0 }
 0x260   : > { %v1262_v4 = vmul.f32 1.442695, %v1254_v2 }
 0x261   : > { %2918 = vpow2.f32 %v1264_v3 }
 0x262   : > { %2920 = vpow2.f32 %v1262_v4 }
 0x26b   : > { %v2919_v5 = vpop.eup %2918 }
 0x26c   : > { %v2921_v6 = vpop.eup %2920  ;;  %v1281_v7 = vsel %vm629_vm2, %v2919_v5, 0.0 }
 0x26d   : > { %1282 = vadd.xlane.f32.xlu0 %v1281_v7  ;;  %v1278_v8 = vsel %vm629_vm2, %v2921_v6, 0.0 }
 0x26e   : > { %1279 = vadd.xlane.f32.xlu1 %v1278_v8 }
 0x2d3   : > { %v1238_v9 = vpop.xlane.xlu0 %1237 }
 0x2d4   : > { %v1256_v10 = vsub.f32 %v1224_v42, %v1238_v9 }
 0x2d6   : > { %v1266_v11 = vmul.f32 1.442695, %v1256_v10 }
 0x2d7   : > { %v1241_v12 = vpop.xlane.xlu0 %1240 }
 0x2d8   : > { %2922 = vpow2.f32 %v1266_v11  ;;  %v1257_v13 = vsub.f32 %v1225_v44, %v1241_v12  ;;  %v1244_v14 = vpop.xlane.xlu1 %1243 }
 0x2d9   : > { %v1258_v15 = vsub.f32 %v1226_v49, %v1244_v14  ;;  %v1383_v49 = vld [vmem:[%s418_s12] sm:$0xff] }
 0x2da   : > { %v1268_v16 = vmul.f32 1.442695, %v1257_v13  ;;  %2707 = vmatprep.subr.mxu0 %v1383_v49 }
 0x2db   : > { %v1270_v17 = vmul.f32 1.442695, %v1258_v15  ;;  %v1247_v18 = vpop.xlane.xlu0 %1246  ;;  %2708 = vmatpush3.msra.mxu0 %v1383_v49 }
 0x2dc   : > { %2924 = vpow2.f32 %v1268_v16  ;;  %v1259_v19 = vsub.f32 %v1227_v51, %v1247_v18 }
 0x2dd   : > { %2926 = vpow2.f32 %v1270_v17 }
 0x2de   : > { %v1272_v20 = vmul.f32 1.442695, %v1259_v19 }
 0x2df   : > { %v1253_v21 = vpop.xlane.xlu0 %1252 }
 0x2e0   : > { %2928 = vpow2.f32 %v1272_v20  ;;  %v1261_v22 = vsub.f32 %v1229_v56, %v1253_v21  ;;  %v1250_v23 = vpop.xlane.xlu1 %1249 }
 0x2e1   : > { %v1260_v24 = vsub.f32 %v1228_v59, %v1250_v23 }
 0x2e2   : > { %v2923_v25 = vpop.eup %2922  ;;  %v1276_v26 = vmul.f32 1.442695, %v1261_v22 }
 0x2e3   : > { %v1274_v27 = vmul.f32 1.442695, %v1260_v24  ;;  %v1284_v28 = vsel %vm629_vm2, %v2923_v25, 0.0 }
 0x2e4   : > { %2930 = vpow2.f32 %v1276_v26  ;;  %1285 = vadd.xlane.f32.xlu1 %v1284_v28 }
 0x2e5   : > { %2932 = vpow2.f32 %v1274_v27 }
 0x2e6   : > { %v2925_v29 = vpop.eup %2924 }
 0x2e7   : > { %v2927_v30 = vpop.eup %2926  ;;  %v1287_v31 = vsel %vm629_vm2, %v2925_v29, 0.0 }
 0x2e8   : > { %1288 = vadd.xlane.f32.xlu0 %v1287_v31  ;;  %v1290_v32 = vsel %vm629_vm2, %v2927_v30, 0.0 }
 0x2e9   : > { %1291 = vadd.xlane.f32.xlu1 %v1290_v32 }
 0x2ea   : > { %v2929_v33 = vpop.eup %2928 }
 0x2eb   : > { %v1293_v34 = vsel %vm629_vm2, %v2929_v33, 0.0 }
 0x2ec   : > { %1294 = vadd.xlane.f32.xlu0 %v1293_v34 }
 0x2ee   : > { %v2931_v35 = vpop.eup %2930 }
 0x2ef   : > { %v2933_v36 = vpop.eup %2932  ;;  %v1299_v37 = vsel %vm629_vm2, %v2931_v35, 0.0 }
 0x2f0   : > { %1300 = vadd.xlane.f32.xlu0 %v1299_v37  ;;  %v1296_v38 = vsel %vm629_vm2, %v2933_v36, 0.0 }
 0x2f1   : > { %1297 = vadd.xlane.f32.xlu1 %v1296_v38 }
 0x2fa   : > { %v1283_v39 = vpop.xlane.xlu0 %1282 }
 0x2fb   : > { %v1304_v40 = vmul.f32 0.125, %v1283_v39  ;;  %v1280_v41 = vpop.xlane.xlu1 %1279 }
 0x2fc   : > { %v1303_v42 = vmul.f32 0.125, %v1280_v41 }
 0x2fd   : > { %v1312_v43 = vsub.f32 %v2919_v5, %v1304_v40 }
 0x2fe   : > { %v1311_v44 = vsub.f32 %v2921_v6, %v1303_v42 }
 0x2ff   : > { %v1320_v45 = vmul.f32 %v1312_v43, %v1312_v43 }
 0x300   : > { %v1319_v46 = vmul.f32 %v1311_v44, %v1311_v44 }
 0x301   : > { %v1330_v47 = vsel %vm629_vm2, %v1320_v45, 0.0 }
 0x302   : > { %1331 = vadd.xlane.f32.xlu0 %v1330_v47  ;;  %v1327_v48 = vsel %vm629_vm2, %v1319_v46, 0.0 }
 0x303   : > { %1328 = vadd.xlane.f32.xlu1 %v1327_v48 }
 0x371   : > { %v1286_v50 = vpop.xlane.xlu1 %1285 }
 0x372   : > { %v1305_v51 = vmul.f32 0.125, %v1286_v50 }
 0x374   : > { %v3127_v52 = vsub.f32 %v2923_v25, %v1305_v51 }
 0x375   : > { %v1289_v53 = vpop.xlane.xlu0 %1288 }
 0x376   : > { %v1306_v54 = vmul.f32 0.125, %v1289_v53  ;;  %v1292_v55 = vpop.xlane.xlu1 %1291  ;;  %v1321_v56 = vmul.f32 %v3127_v52, %v3127_v52 }
 0x377   : > { %v1307_v57 = vmul.f32 0.125, %v1292_v55 }
 0x378   : > { %v3131_v58 = vsub.f32 %v2925_v29, %v1306_v54  ;;  %v1333_v59 = vsel %vm629_vm2, %v1321_v56, 0.0  ;;  %v2466_v56 = vld [vmem:[%s421_s15] ss:$0 sm:$0xff] }
 0x379   : > { %v3134_v60 = vsub.f32 %v2927_v30, %v1307_v57  ;;  %v1295_v61 = vpop.xlane.xlu0 %1294  ;;  %1334 = vadd.xlane.f32.xlu1 %v1333_v59 }
 0x37a   : > { %v1308_v62 = vmul.f32 0.125, %v1295_v61  ;;  %v1322_v63 = vmul.f32 %v3131_v58, %v3131_v58 }
 0x37b   : > { %v1323_v0 = vmul.f32 %v3134_v60, %v3134_v60 }
 0x37c   : > { %v3140_v1 = vsub.f32 %v2929_v33, %v1308_v62  ;;  %v1336_v2 = vsel %vm629_vm2, %v1322_v63, 0.0 }
 0x37d   : > { %1337 = vadd.xlane.f32.xlu0 %v1336_v2  ;;  %v1301_v3 = vpop.xlane.xlu0 %1300  ;;  %v1339_v4 = vsel %vm629_vm2, %v1323_v0, 0.0  ;;  %v1543_v2 = vld [vmem:[%s3173_s22] sm:$0xff] }
 0x37e   : > { %v1310_v5 = vmul.f32 0.125, %v1301_v3  ;;  %1340 = vadd.xlane.f32.xlu1 %v1339_v4  ;;  %v1298_v6 = vpop.xlane.xlu1 %1297  ;;  %v1324_v7 = vmul.f32 %v3140_v1, %v3140_v1 }
 0x37f   : > { %v1309_v8 = vmul.f32 0.125, %v1298_v6 }
 0x380   : > { %v1318_v9 = vsub.f32 %v2931_v35, %v1310_v5  ;;  %v1342_v10 = vsel %vm629_vm2, %v1324_v7, 0.0 }
 0x381   : > { %v1317_v11 = vsub.f32 %v2933_v36, %v1309_v8  ;;  %1343 = vadd.xlane.f32.xlu0 %v1342_v10 }
 0x382   : > { %v1326_v12 = vmul.f32 %v1318_v9, %v1318_v9 }
 0x383   : > { %v1325_v13 = vmul.f32 %v1317_v11, %v1317_v11 }
 0x384   : > { %v1348_v14 = vsel %vm629_vm2, %v1326_v12, 0.0 }
 0x385   : > { %1349 = vadd.xlane.f32.xlu0 %v1348_v14  ;;  %v1345_v15 = vsel %vm629_vm2, %v1325_v13, 0.0 }
 0x386   : > { %1346 = vadd.xlane.f32.xlu1 %v1345_v15 }
 0x38f   : > { %v1332_v16 = vpop.xlane.xlu0 %1331 }
 0x390   : > { %v1352_v17 = vmul.f32 0.125, %v1332_v16  ;;  %v1329_v18 = vpop.xlane.xlu1 %1328 }
 0x391   : > { %v1351_v19 = vmul.f32 0.125, %v1329_v18 }
 0x392   : > { %v1360_v20 = vadd.f32 1e-05, %v1352_v17 }
 0x393   : > { %v1359_v21 = vadd.f32 1e-05, %v1351_v19 }
 0x394   : > { %2934 = vrsqrt.f32 %v1360_v20 }
 0x395   : > { %2936 = vrsqrt.f32 %v1359_v21 }
 0x39e   : > { %v2935_v22 = vpop.eup %2934 }
 0x39f   : > { %v2937_v23 = vpop.eup %2936  ;;  %v1376_v25 = vmul.f32 %v2935_v22, %v1312_v43 }
 0x3a0   : > { %v1375_v24 = vmul.f32 %v2937_v23, %v1311_v44 }
 0x3a2   : > { %2709 = vmatprep.mubr.msk.f32.mxu0 %vm629_vm2, %v1375_v24  ;;  %v1574_v24 = vld [vmem:[%s3173_s22 + $0xf8] sm:$0xff] }
 0x3a3   : > { %2710 = vmatmul.mubr.msk.f32.vlgmr.msra.gmra.mrb[10].mxu0 %vm629_vm2, %v1376_v25  ;;  %v1544_v25 = vld [vmem:[%s3173_s22 + $0x8] sm:$0xff] }
 0x406   : > { %v1335_v26 = vpop.xlane.xlu1 %1334 }
 0x407   : > { %v1353_v27 = vmul.f32 0.125, %v1335_v26  ;;  %v1575_v26 = vld [vmem:[%s3173_s22 + $0x100] sm:$0xff] }
 0x409   : > { %v1361_v28 = vadd.f32 1e-05, %v1353_v27  ;;  %v1545_v27 = vld [vmem:[%s3173_s22 + $0x10] sm:$0xff] }
 0x40a   : > { %v1338_v29 = vpop.xlane.xlu0 %1337 }
 0x40b   : > { %2938 = vrsqrt.f32 %v1361_v28  ;;  %v1354_v30 = vmul.f32 0.125, %v1338_v29  ;;  %v1341_v31 = vpop.xlane.xlu1 %1340  ;;  %v1576_v28 = vld [vmem:[%s3173_s22 + $0x108] sm:$0xff]  ;;  %v1546_v29 = vld [vmem:[%s3173_s22 + $0x18] sm:$0xff] }
 0x40c   : > { %v1355_v32 = vmul.f32 0.125, %v1341_v31  ;;  %v1547_v31 = vld [vmem:[%s3173_s22 + $0x20] sm:$0xff] }
 0x40d   : > { %v1362_v33 = vadd.f32 1e-05, %v1354_v30  ;;  %v1577_v30 = vld [vmem:[%s3173_s22 + $0x110] sm:$0xff] }
 0x40e   : > { %v1363_v34 = vadd.f32 1e-05, %v1355_v32  ;;  %v1344_v35 = vpop.xlane.xlu0 %1343  ;;  %v1578_v32 = vld [vmem:[%s3173_s22 + $0x118] sm:$0xff] }
 0x40f   : > { %2940 = vrsqrt.f32 %v1362_v33  ;;  %v1356_v36 = vmul.f32 0.125, %v1344_v35  ;;  %v1548_v33 = vld [vmem:[%s3173_s22 + $0x28] sm:$0xff]  ;;  %v1549_v35 = vld [vmem:[%s3173_s22 + $0x30] sm:$0xff] }
 0x410   : > { %2942 = vrsqrt.f32 %v1363_v34  ;;  %v1579_v34 = vld [vmem:[%s3173_s22 + $0x120] sm:$0xff] }
 0x411   : > { %v1364_v37 = vadd.f32 1e-05, %v1356_v36  ;;  %v1580_v36 = vld [vmem:[%s3173_s22 + $0x128] sm:$0xff] }
 0x412   : > { %v1350_v38 = vpop.xlane.xlu0 %1349 }
 0x413   : > { %2944 = vrsqrt.f32 %v1364_v37  ;;  %v1358_v39 = vmul.f32 0.125, %v1350_v38  ;;  %v1347_v40 = vpop.xlane.xlu1 %1346  ;;  %v1550_v37 = vld [vmem:[%s3173_s22 + $0x38] sm:$0xff]  ;;  %v1581_v38 = vld [vmem:[%s3173_s22 + $0x130] sm:$0xff] }
 0x414   : > { %v1357_v41 = vmul.f32 0.125, %v1347_v40  ;;  %v1582_v40 = vld [vmem:[%s3173_s22 + $0x138] sm:$0xff] }
 0x415   : > { %v2939_v42 = vpop.eup %2938  ;;  %v1366_v43 = vadd.f32 1e-05, %v1358_v39  ;;  %v1551_v39 = vld [vmem:[%s3173_s22 + $0x40] sm:$0xff] }
 0x416   : > { %v1365_v44 = vadd.f32 1e-05, %v1357_v41  ;;  %v1377_v45 = vmul.f32 %v2939_v42, %v3127_v52  ;;  %v1552_v41 = vld [vmem:[%s3173_s22 + $0x48] sm:$0xff]  ;;  %v1583_v42 = vld [vmem:[%s3173_s22 + $0x140] sm:$0xff] }
 0x417   : > { %2946 = vrsqrt.f32 %v1366_v43  ;;  %v1553_v43 = vld [vmem:[%s3173_s22 + $0x50] sm:$0xff] }
 0x418   : > { %2948 = vrsqrt.f32 %v1365_v44  ;;  %2712 = vmatprep.mubr.msk.f32.mxu0 %vm629_vm2, %v1377_v45  ;;  %v1584_v44 = vld [vmem:[%s3173_s22 + $0x148] sm:$0xff]  ;;  %v1554_v45 = vld [vmem:[%s3173_s22 + $0x58] sm:$0xff] }
 0x419   : > { %v2941_v46 = vpop.eup %2940 }
 0x41a   : > { %v2943_v47 = vpop.eup %2942  ;;  %v1378_v48 = vmul.f32 %v2941_v46, %v3131_v58  ;;  %v2467_v58 = vld [vmem:[%s424_s18] ss:$0 sm:$0xff]  ;;  %v1585_v46 = vld [vmem:[%s3173_s22 + $0x150] sm:$0xff] }
 0x41b   : > { %v1379_v49 = vmul.f32 %v2943_v47, %v3134_v60  ;;  %v1555_v47 = vld [vmem:[%s3173_s22 + $0x60] sm:$0xff] }
 0x41c   : > { %2713 = vmatmul.mubr.msk.f32.gmra.mrb[12].mxu0 %vm629_vm2, %v1378_v48  ;;  %v1586_v48 = vld [vmem:[%s3173_s22 + $0x158] sm:$0xff] }
 0x41d   : > { %v2945_v50 = vpop.eup %2944  ;;  %2715 = vmatprep.mubr.msk.f32.mxu0 %vm629_vm2, %v1379_v49  ;;  %v1556_v49 = vld [vmem:[%s3173_s22 + $0x68] sm:$0xff] }
 0x41e   : > { %v1380_v51 = vmul.f32 %v2945_v50, %v3140_v1  ;;  %v1573_v1 = vld [vmem:[%s3173_s22 + $0xf0] sm:$0xff]  ;;  %v1587_v50 = vld [vmem:[%s3173_s22 + $0x160] sm:$0xff] }
 0x41f   : > { %2782 = vmatprep.mubr.msk.f32.mxu1 %vm1607_vm3, %v1573_v1  ;;  %v1564_v1 = vld [vmem:[%s3173_s22 + $0xa8] sm:$0xff] }
 0x420   : > { %2716 = vmatmul.mubr.msk.f32.gmra.mrb[14].mxu0 %vm629_vm2, %v1380_v51  ;;  %v1557_v51 = vld [vmem:[%s3173_s22 + $0x70] sm:$0xff] }
 0x421   : > { %v2947_v52 = vpop.eup %2946 }
 0x422   : > { %v2949_v53 = vpop.eup %2948  ;;  %v1382_v54 = vmul.f32 %v2947_v52, %v1318_v9  ;;  %v1588_v52 = vld [vmem:[%s3173_s22 + $0x168] sm:$0xff] }
 0x423   : > { %v1381_v55 = vmul.f32 %v2949_v53, %v1317_v11  ;;  %v1558_v53 = vld [vmem:[%s3173_s22 + $0x78] sm:$0xff] }
 0x425   : > { %2718 = vmatprep.mubr.msk.f32.mxu0 %vm629_vm2, %v1381_v55  ;;  %v1559_v55 = vld [vmem:[%s3173_s22 + $0x80] sm:$0xff] }
 0x426   : > { %2719 = vmatmul.mubr.msk.f32.gmra.mrb[16].mxu0 %vm629_vm2, %v1382_v54  ;;  %v1589_v54 = vld [vmem:[%s3173_s22 + $0x170] sm:$0xff] }
 0x427   : > { %2737 = vmatprep.mubr.msk.f32.mxu0 %vm1607_vm3, %v1543_v2  ;;  %v1595_v2 = vld [vmem:[%s3173_s22 + $0x1a0] sm:$0xff] }
 0x476   : > { %v2711_v57 = vpop.f32.mrb[10].mxu0 }
 0x477   : > { %v1521_v59 = vmul.f32 %v2711_v57, %v2466_v56  ;;  %v1474_v60 = vpop.f32.mrb[11].mxu0  ;;  %v1560_v57 = vld [vmem:[%s3173_s22 + $0x88] sm:$0xff] }
 0x478   : > { %v1520_v61 = vmul.f32 %v2466_v56, %v1474_v60  ;;  %v1592_v60 = vld [vmem:[%s3173_s22 + $0x188] sm:$0xff] }
 0x479   : > { %v1536_v62 = vadd.f32 %v2467_v58, %v1521_v59  ;;  %v1561_v59 = vld [vmem:[%s3173_s22 + $0x90] sm:$0xff] }
 0x47a   : > { %v1535_v63 = vadd.f32 %v2467_v58, %v1520_v61  ;;  %v1562_v61 = vld [vmem:[%s3173_s22 + $0x98] sm:$0xff] }
 0x47c   : > { %v2849_v0 = vpack.c.bf16 %v1536_v62, %v1535_v63  ;;  %v1593_v62 = vld [vmem:[%s3173_s22 + $0x190] sm:$0xff]  ;;  %v1563_v63 = vld [vmem:[%s3173_s22 + $0xa0] sm:$0xff] }
 0x47e   : > { %2850 = vmatprep.subr.bf16.mxu0 %v2849_v0  ;;  %2865 = vmatprep.subr.bf16.mxu1 %v2849_v0 }
 0x47f   : > { %2852 = vmatpush3.bf16.msra.mxu0 %v2849_v0  ;;  %2869 = vmatpush3.bf16.msra.mxu1 %v2849_v0  ;;  %v1594_v0 = vld [vmem:[%s3173_s22 + $0x198] sm:$0xff] }
 0x4ef   : > { %v2714_v3 = vpop.f32.mrb[12].mxu0 }
 0x4f0   : > { %v1523_v4 = vmul.f32 %v2714_v3, %v2466_v56  ;;  %v1484_v5 = vpop.f32.mrb[13].mxu0  ;;  %v1565_v3 = vld [vmem:[%s3173_s22 + $0xb0] sm:$0xff] }
 0x4f1   : > { %v1522_v6 = vmul.f32 %v2466_v56, %v1484_v5  ;;  %v1566_v5 = vld [vmem:[%s3173_s22 + $0xb8] sm:$0xff] }
 0x4f2   : > { %v1538_v7 = vadd.f32 %v2467_v58, %v1523_v4  ;;  %v1596_v4 = vld [vmem:[%s3173_s22 + $0x1a8] sm:$0xff] }
 0x4f3   : > { %v1537_v8 = vadd.f32 %v2467_v58, %v1522_v6  ;;  %v2717_v9 = vpop.f32.mrb[14].mxu0  ;;  %v1597_v6 = vld [vmem:[%s3173_s22 + $0x1b0] sm:$0xff] }
 0x4f4   : > { %v1525_v10 = vmul.f32 %v2717_v9, %v2466_v56  ;;  %v1494_v11 = vpop.f32.mrb[15].mxu0  ;;  %v1568_v9 = vld [vmem:[%s3173_s22 + $0xc8] sm:$0xff] }
 0x4f5   : > { %v2853_v12 = vpack.c.bf16 %v1538_v7, %v1537_v8  ;;  %v1524_v13 = vmul.f32 %v2466_v56, %v1494_v11  ;;  %v1567_v7 = vld [vmem:[%s3173_s22 + $0xc0] sm:$0xff]  ;;  %v1598_v8 = vld [vmem:[%s3173_s22 + $0x1b8] sm:$0xff]  ;;  %v1569_v11 = vld [vmem:[%s3173_s22 + $0xd0] sm:$0xff] }
 0x4f6   : > { %v1540_v14 = vadd.f32 %v2467_v58, %v1525_v10  ;;  %v1599_v10 = vld [vmem:[%s3173_s22 + $0x1c0] sm:$0xff] }
 0x4f7   : > { %v1539_v15 = vadd.f32 %v2467_v58, %v1524_v13  ;;  %2854 = vmatprep.subr.bf16.mxu0 %v2853_v12  ;;  %2866 = vmatprep.subr.bf16.mxu1 %v2853_v12  ;;  %v1570_v13 = vld [vmem:[%s3173_s22 + $0xd8] sm:$0xff] }
 0x4f8   : > { %2856 = vmatpush3.bf16.msra.mxu0 %v2853_v12  ;;  %2870 = vmatpush3.bf16.msra.mxu1 %v2853_v12  ;;  %v1600_v12 = vld [vmem:[%s3173_s22 + $0x1c8] sm:$0xff] }
 0x4f9   : > { %v2857_v16 = vpack.c.bf16 %v1540_v14, %v1539_v15  ;;  %v2720_v17 = vpop.f32.mrb[16].mxu0  ;;  %v1601_v14 = vld [vmem:[%s3173_s22 + $0x1d0] sm:$0xff]  ;;  %v1571_v15 = vld [vmem:[%s3173_s22 + $0xe0] sm:$0xff] }
 0x4fa   : > { %v1527_v18 = vmul.f32 %v2720_v17, %v2466_v56  ;;  %v1504_v19 = vpop.f32.mrb[17].mxu0  ;;  %v1572_v17 = vld [vmem:[%s3173_s22 + $0xe8] sm:$0xff] }
 0x4fb   : > { %v1526_v20 = vmul.f32 %v2466_v56, %v1504_v19  ;;  %2858 = vmatprep.subr.bf16.mxu0 %v2857_v16  ;;  %2867 = vmatprep.subr.bf16.mxu1 %v2857_v16  ;;  %v1590_v56 = vld [vmem:[%s3173_s22 + $0x178] sm:$0xff]  ;;  %v1604_v19 = vld [vmem:[%s3173_s22 + $0x1e8] sm:$0xff] }
 0x4fc   : > { %v1542_v21 = vadd.f32 %v2467_v58, %v1527_v18  ;;  %2860 = vmatpush3.bf16.msra.mxu0 %v2857_v16  ;;  %2871 = vmatpush3.bf16.msra.mxu1 %v2857_v16  ;;  %v1602_v16 = vld [vmem:[%s3173_s22 + $0x1d8] sm:$0xff]  ;;  %v1603_v18 = vld [vmem:[%s3173_s22 + $0x1e0] sm:$0xff] }
 0x4fd   : > { %v1541_v22 = vadd.f32 %v2467_v58, %v1526_v20  ;;  %v1591_v58 = vld [vmem:[%s3173_s22 + $0x180] sm:$0xff]  ;;  %v1605_v20 = vld [vmem:[%s3173_s22 + $0x1f0] sm:$0xff] }
 0x4ff   : > { %v2861_v23 = vpack.c.bf16 %v1542_v21, %v1541_v22  ;;  %v1606_v21 = vld [vmem:[%s3173_s22 + $0x1f8] sm:$0xff] }
 0x501   : > { %2862 = vmatprep.subr.bf16.mxu0 %v2861_v23  ;;  %2868 = vmatprep.subr.bf16.mxu1 %v2861_v23 }
 0x502   : > { %2864 = vmatpush3.bf16.msra.mxu0 %v2861_v23  ;;  %2872 = vmatpush3.bf16.msra.mxu1 %v2861_v23 }
 0x505   : > { %2783 = vmatmul.mubr.msk.f32.vlgmr.msra.gmra.mrb[10].mxu1 %vm1607_vm3, %v1574_v24  ;;  %2738 = vmatmul.mubr.msk.f32.vlgmr.msra.gmra.mrb[18].mxu0 %vm1607_vm3, %v1544_v25 }
 0x506   : > { %2785 = vmatprep.mubr.msk.f32.mxu1 %vm1607_vm3, %v1575_v26  ;;  %2740 = vmatprep.mubr.msk.f32.mxu0 %vm1607_vm3, %v1545_v27 }
 0x509   : > { %2786 = vmatmul.mubr.msk.f32.gmra.mrb[12].mxu1 %vm1607_vm3, %v1576_v28  ;;  %2741 = vmatmul.mubr.msk.f32.gmra.mrb[20].mxu0 %vm1607_vm3, %v1546_v29 }
 0x50a   : > { %2788 = vmatprep.mubr.msk.f32.mxu1 %vm1607_vm3, %v1577_v30  ;;  %2743 = vmatprep.mubr.msk.f32.mxu0 %vm1607_vm3, %v1547_v31 }
 0x50d   : > { %2789 = vmatmul.mubr.msk.f32.gmra.mrb[14].mxu1 %vm1607_vm3, %v1578_v32  ;;  %2744 = vmatmul.mubr.msk.f32.gmra.mrb[22].mxu0 %vm1607_vm3, %v1548_v33 }
 0x50e   : > { %2791 = vmatprep.mubr.msk.f32.mxu1 %vm1607_vm3, %v1579_v34  ;;  %2746 = vmatprep.mubr.msk.f32.mxu0 %vm1607_vm3, %v1549_v35 }
 0x511   : > { %2792 = vmatmul.mubr.msk.f32.gmra.mrb[16].mxu1 %vm1607_vm3, %v1580_v36  ;;  %2747 = vmatmul.mubr.msk.f32.gmra.mrb[24].mxu0 %vm1607_vm3, %v1550_v37 }
 0x512   : > { %2794 = vmatprep.mubr.msk.f32.mxu1 %vm1607_vm3, %v1581_v38  ;;  %2749 = vmatprep.mubr.msk.f32.mxu0 %vm1607_vm3, %v1551_v39 }
 0x515   : > { %2795 = vmatmul.mubr.msk.f32.gmra.mrb[18].mxu1 %vm1607_vm3, %v1582_v40  ;;  %2750 = vmatmul.mubr.msk.f32.gmra.mrb[26].mxu0 %vm1607_vm3, %v1552_v41 }
 0x516   : > { %2797 = vmatprep.mubr.msk.f32.mxu1 %vm1607_vm3, %v1583_v42  ;;  %2752 = vmatprep.mubr.msk.f32.mxu0 %vm1607_vm3, %v1553_v43 }
 0x519   : > { %2798 = vmatmul.mubr.msk.f32.gmra.mrb[20].mxu1 %vm1607_vm3, %v1584_v44  ;;  %2753 = vmatmul.mubr.msk.f32.gmra.mrb[28].mxu0 %vm1607_vm3, %v1554_v45 }
 0x51a   : > { %2800 = vmatprep.mubr.msk.f32.mxu1 %vm1607_vm3, %v1585_v46  ;;  %2755 = vmatprep.mubr.msk.f32.mxu0 %vm1607_vm3, %v1555_v47 }
 0x51d   : > { %2801 = vmatmul.mubr.msk.f32.gmra.mrb[22].mxu1 %vm1607_vm3, %v1586_v48  ;;  %2756 = vmatmul.mubr.msk.f32.gmra.mrb[30].mxu0 %vm1607_vm3, %v1556_v49 }
 0x51e   : > { %2803 = vmatprep.mubr.msk.f32.mxu1 %vm1607_vm3, %v1587_v50  ;;  %2758 = vmatprep.mubr.msk.f32.mxu0 %vm1607_vm3, %v1557_v51 }
 0x521   : > { %2804 = vmatmul.mubr.msk.f32.gmra.mrb[24].mxu1 %vm1607_vm3, %v1588_v52  ;;  %2759 = vmatmul.mubr.msk.f32.gmra.mrb[32].mxu0 %vm1607_vm3, %v1558_v53 }
 0x522   : > { %2806 = vmatprep.mubr.msk.f32.mxu1 %vm1607_vm3, %v1589_v54  ;;  %2761 = vmatprep.mubr.msk.f32.mxu0 %vm1607_vm3, %v1559_v55 }
 0x525   : > { %2807 = vmatmul.mubr.msk.f32.gmra.mrb[26].mxu1 %vm1607_vm3, %v1590_v56  ;;  %2762 = vmatmul.mubr.msk.f32.gmra.mrb[34].mxu0 %vm1607_vm3, %v1560_v57 }
 0x526   : > { %2809 = vmatprep.mubr.msk.f32.mxu1 %vm1607_vm3, %v1591_v58  ;;  %2764 = vmatprep.mubr.msk.f32.mxu0 %vm1607_vm3, %v1561_v59 }
 0x529   : > { %2810 = vmatmul.mubr.msk.f32.gmra.mrb[28].mxu1 %vm1607_vm3, %v1592_v60  ;;  %2765 = vmatmul.mubr.msk.f32.gmra.mrb[36].mxu0 %vm1607_vm3, %v1562_v61 }
 0x52a   : > { %2812 = vmatprep.mubr.msk.f32.mxu1 %vm1607_vm3, %v1593_v62  ;;  %2767 = vmatprep.mubr.msk.f32.mxu0 %vm1607_vm3, %v1563_v63 }
 0x52d   : > { %2813 = vmatmul.mubr.msk.f32.gmra.mrb[30].mxu1 %vm1607_vm3, %v1594_v0  ;;  %2768 = vmatmul.mubr.msk.f32.gmra.mrb[38].mxu0 %vm1607_vm3, %v1564_v1 }
 0x52e   : > { %2815 = vmatprep.mubr.msk.f32.mxu1 %vm1607_vm3, %v1595_v2  ;;  %2770 = vmatprep.mubr.msk.f32.mxu0 %vm1607_vm3, %v1565_v3 }
 0x531   : > { %2816 = vmatmul.mubr.msk.f32.gmra.mrb[32].mxu1 %vm1607_vm3, %v1596_v4  ;;  %2771 = vmatmul.mubr.msk.f32.gmra.mrb[40].mxu0 %vm1607_vm3, %v1566_v5 }
 0x532   : > { %2818 = vmatprep.mubr.msk.f32.mxu1 %vm1607_vm3, %v1597_v6  ;;  %2773 = vmatprep.mubr.msk.f32.mxu0 %vm1607_vm3, %v1567_v7 }
 0x535   : > { %2819 = vmatmul.mubr.msk.f32.gmra.mrb[34].mxu1 %vm1607_vm3, %v1598_v8  ;;  %2774 = vmatmul.mubr.msk.f32.gmra.mrb[42].mxu0 %vm1607_vm3, %v1568_v9 }
 0x536   : > { %2821 = vmatprep.mubr.msk.f32.mxu1 %vm1607_vm3, %v1599_v10  ;;  %2776 = vmatprep.mubr.msk.f32.mxu0 %vm1607_vm3, %v1569_v11 }
 0x539   : > { %2822 = vmatmul.mubr.msk.f32.gmra.mrb[36].mxu1 %vm1607_vm3, %v1600_v12  ;;  %2777 = vmatmul.mubr.msk.f32.gmra.mrb[44].mxu0 %vm1607_vm3, %v1570_v13 }
 0x53a   : > { %2824 = vmatprep.mubr.msk.f32.mxu1 %vm1607_vm3, %v1601_v14  ;;  %2779 = vmatprep.mubr.msk.f32.mxu0 %vm1607_vm3, %v1571_v15 }
 0x53d   : > { %2825 = vmatmul.mubr.msk.f32.gmra.mrb[38].mxu1 %vm1607_vm3, %v1602_v16  ;;  %2780 = vmatmul.mubr.msk.f32.gmra.mrb[46].mxu0 %vm1607_vm3, %v1572_v17 }
 0x53e   : > { %2827 = vmatprep.mubr.msk.f32.mxu1 %vm1607_vm3, %v1603_v18 }
 0x541   : > { %2828 = vmatmul.mubr.msk.f32.gmra.mrb[40].mxu1 %vm1607_vm3, %v1604_v19 }
 0x542   : > { %2830 = vmatprep.mubr.msk.f32.mxu1 %vm1607_vm3, %v1605_v20 }
 0x545   : > { %2831 = vmatmul.mubr.msk.f32.gmra.mrb[42].mxu1 %vm1607_vm3, %v1606_v21 }
 0x5d8   : > { %v2784_v22 = vpop.f32.mrb[10].mxu1  ;;  %v2739_v23 = vpop.f32.mrb[18].mxu0 }
 0x5d9   : > { %2216 = vst.msk [vmem:[%s3308_s13 + $0xf8] sm:$0xff] %vm1607_vm3, %v2784_v22  ;;  %v2016_v24 = vpop.f32.mrb[11].mxu1  ;;  %2186 = vst.msk [vmem:[%s3308_s13 + $0x8] sm:$0xff] %vm1607_vm3, %v2739_v23  ;;  %v1866_v25 = vpop.f32.mrb[19].mxu0 }
 0x5da   : > { %2215 = vst.msk [vmem:[%s3308_s13 + $0xf0] sm:$0xff] %vm1607_vm3, %v2016_v24  ;;  %2185 = vst.msk [vmem:[%s3308_s13] sm:$0xff] %vm1607_vm3, %v1866_v25 }
 0x5dc   : > { %v2787_v26 = vpop.f32.mrb[12].mxu1  ;;  %v2742_v27 = vpop.f32.mrb[20].mxu0 }
 0x5dd   : > { %2218 = vst.msk [vmem:[%s3308_s13 + $0x108] sm:$0xff] %vm1607_vm3, %v2787_v26  ;;  %v2026_v28 = vpop.f32.mrb[13].mxu1  ;;  %2188 = vst.msk [vmem:[%s3308_s13 + $0x18] sm:$0xff] %vm1607_vm3, %v2742_v27  ;;  %v1876_v29 = vpop.f32.mrb[21].mxu0 }
 0x5de   : > { %2217 = vst.msk [vmem:[%s3308_s13 + $0x100] sm:$0xff] %vm1607_vm3, %v2026_v28  ;;  %2187 = vst.msk [vmem:[%s3308_s13 + $0x10] sm:$0xff] %vm1607_vm3, %v1876_v29 }
 0x5e0   : > { %v2790_v30 = vpop.f32.mrb[14].mxu1  ;;  %v2745_v31 = vpop.f32.mrb[22].mxu0 }
 0x5e1   : > { %2220 = vst.msk [vmem:[%s3308_s13 + $0x118] sm:$0xff] %vm1607_vm3, %v2790_v30  ;;  %v2036_v32 = vpop.f32.mrb[15].mxu1  ;;  %2190 = vst.msk [vmem:[%s3308_s13 + $0x28] sm:$0xff] %vm1607_vm3, %v2745_v31  ;;  %v1886_v33 = vpop.f32.mrb[23].mxu0 }
 0x5e2   : > { %2219 = vst.msk [vmem:[%s3308_s13 + $0x110] sm:$0xff] %vm1607_vm3, %v2036_v32  ;;  %2189 = vst.msk [vmem:[%s3308_s13 + $0x20] sm:$0xff] %vm1607_vm3, %v1886_v33 }
 0x5e4   : > { %v2793_v34 = vpop.f32.mrb[16].mxu1  ;;  %v2748_v35 = vpop.f32.mrb[24].mxu0 }
 0x5e5   : > { %2222 = vst.msk [vmem:[%s3308_s13 + $0x128] sm:$0xff] %vm1607_vm3, %v2793_v34  ;;  %v2046_v36 = vpop.f32.mrb[17].mxu1  ;;  %2192 = vst.msk [vmem:[%s3308_s13 + $0x38] sm:$0xff] %vm1607_vm3, %v2748_v35  ;;  %v1896_v37 = vpop.f32.mrb[25].mxu0 }
 0x5e6   : > { %2221 = vst.msk [vmem:[%s3308_s13 + $0x120] sm:$0xff] %vm1607_vm3, %v2046_v36  ;;  %2191 = vst.msk [vmem:[%s3308_s13 + $0x30] sm:$0xff] %vm1607_vm3, %v1896_v37 }
 0x5e8   : > { %v2796_v38 = vpop.f32.mrb[18].mxu1  ;;  %v2751_v39 = vpop.f32.mrb[26].mxu0 }
 0x5e9   : > { %2224 = vst.msk [vmem:[%s3308_s13 + $0x138] sm:$0xff] %vm1607_vm3, %v2796_v38  ;;  %v2056_v40 = vpop.f32.mrb[19].mxu1  ;;  %2194 = vst.msk [vmem:[%s3308_s13 + $0x48] sm:$0xff] %vm1607_vm3, %v2751_v39  ;;  %v1906_v41 = vpop.f32.mrb[27].mxu0 }
 0x5ea   : > { %2223 = vst.msk [vmem:[%s3308_s13 + $0x130] sm:$0xff] %vm1607_vm3, %v2056_v40  ;;  %2193 = vst.msk [vmem:[%s3308_s13 + $0x40] sm:$0xff] %vm1607_vm3, %v1906_v41 }
 0x5ec   : > { %v2799_v42 = vpop.f32.mrb[20].mxu1  ;;  %v2754_v43 = vpop.f32.mrb[28].mxu0 }
 0x5ed   : > { %2226 = vst.msk [vmem:[%s3308_s13 + $0x148] sm:$0xff] %vm1607_vm3, %v2799_v42  ;;  %v2066_v44 = vpop.f32.mrb[21].mxu1  ;;  %2196 = vst.msk [vmem:[%s3308_s13 + $0x58] sm:$0xff] %vm1607_vm3, %v2754_v43  ;;  %v1916_v45 = vpop.f32.mrb[29].mxu0 }
 0x5ee   : > { %2225 = vst.msk [vmem:[%s3308_s13 + $0x140] sm:$0xff] %vm1607_vm3, %v2066_v44  ;;  %2195 = vst.msk [vmem:[%s3308_s13 + $0x50] sm:$0xff] %vm1607_vm3, %v1916_v45 }
 0x5f0   : > { %v2802_v46 = vpop.f32.mrb[22].mxu1  ;;  %v2757_v47 = vpop.f32.mrb[30].mxu0 }
 0x5f1   : > { %2228 = vst.msk [vmem:[%s3308_s13 + $0x158] sm:$0xff] %vm1607_vm3, %v2802_v46  ;;  %v2076_v48 = vpop.f32.mrb[23].mxu1  ;;  %2198 = vst.msk [vmem:[%s3308_s13 + $0x68] sm:$0xff] %vm1607_vm3, %v2757_v47  ;;  %v1926_v49 = vpop.f32.mrb[31].mxu0 }
 0x5f2   : > { %2227 = vst.msk [vmem:[%s3308_s13 + $0x150] sm:$0xff] %vm1607_vm3, %v2076_v48  ;;  %2197 = vst.msk [vmem:[%s3308_s13 + $0x60] sm:$0xff] %vm1607_vm3, %v1926_v49 }
 0x5f4   : > { %v2805_v50 = vpop.f32.mrb[24].mxu1  ;;  %v2760_v51 = vpop.f32.mrb[32].mxu0 }
 0x5f5   : > { %2230 = vst.msk [vmem:[%s3308_s13 + $0x168] sm:$0xff] %vm1607_vm3, %v2805_v50  ;;  %v2086_v52 = vpop.f32.mrb[25].mxu1  ;;  %2200 = vst.msk [vmem:[%s3308_s13 + $0x78] sm:$0xff] %vm1607_vm3, %v2760_v51  ;;  %v1936_v53 = vpop.f32.mrb[33].mxu0 }
 0x5f6   : > { %2229 = vst.msk [vmem:[%s3308_s13 + $0x160] sm:$0xff] %vm1607_vm3, %v2086_v52  ;;  %2199 = vst.msk [vmem:[%s3308_s13 + $0x70] sm:$0xff] %vm1607_vm3, %v1936_v53 }
 0x5f8   : > { %v2808_v54 = vpop.f32.mrb[26].mxu1  ;;  %v2763_v55 = vpop.f32.mrb[34].mxu0 }
 0x5f9   : > { %2232 = vst.msk [vmem:[%s3308_s13 + $0x178] sm:$0xff] %vm1607_vm3, %v2808_v54  ;;  %v2096_v56 = vpop.f32.mrb[27].mxu1  ;;  %2202 = vst.msk [vmem:[%s3308_s13 + $0x88] sm:$0xff] %vm1607_vm3, %v2763_v55  ;;  %v1946_v57 = vpop.f32.mrb[35].mxu0 }
 0x5fa   : > { %2231 = vst.msk [vmem:[%s3308_s13 + $0x170] sm:$0xff] %vm1607_vm3, %v2096_v56  ;;  %2201 = vst.msk [vmem:[%s3308_s13 + $0x80] sm:$0xff] %vm1607_vm3, %v1946_v57 }
 0x5fc   : > { %v2811_v58 = vpop.f32.mrb[28].mxu1  ;;  %v2766_v59 = vpop.f32.mrb[36].mxu0 }
 0x5fd   : > { %2234 = vst.msk [vmem:[%s3308_s13 + $0x188] sm:$0xff] %vm1607_vm3, %v2811_v58  ;;  %v2106_v60 = vpop.f32.mrb[29].mxu1  ;;  %2204 = vst.msk [vmem:[%s3308_s13 + $0x98] sm:$0xff] %vm1607_vm3, %v2766_v59  ;;  %v1956_v61 = vpop.f32.mrb[37].mxu0 }
 0x5fe   : > { %2233 = vst.msk [vmem:[%s3308_s13 + $0x180] sm:$0xff] %vm1607_vm3, %v2106_v60  ;;  %2203 = vst.msk [vmem:[%s3308_s13 + $0x90] sm:$0xff] %vm1607_vm3, %v1956_v61 }
 0x600   : > { %v2814_v62 = vpop.f32.mrb[30].mxu1  ;;  %v2769_v63 = vpop.f32.mrb[38].mxu0 }
 0x601   : > { %2236 = vst.msk [vmem:[%s3308_s13 + $0x198] sm:$0xff] %vm1607_vm3, %v2814_v62  ;;  %v2116_v0 = vpop.f32.mrb[31].mxu1  ;;  %2206 = vst.msk [vmem:[%s3308_s13 + $0xa8] sm:$0xff] %vm1607_vm3, %v2769_v63  ;;  %v1966_v1 = vpop.f32.mrb[39].mxu0 }
 0x602   : > { %2235 = vst.msk [vmem:[%s3308_s13 + $0x190] sm:$0xff] %vm1607_vm3, %v2116_v0  ;;  %2205 = vst.msk [vmem:[%s3308_s13 + $0xa0] sm:$0xff] %vm1607_vm3, %v1966_v1 }
 0x604   : > { %v2817_v2 = vpop.f32.mrb[32].mxu1  ;;  %v2772_v3 = vpop.f32.mrb[40].mxu0 }
 0x605   : > { %2238 = vst.msk [vmem:[%s3308_s13 + $0x1a8] sm:$0xff] %vm1607_vm3, %v2817_v2  ;;  %v2126_v4 = vpop.f32.mrb[33].mxu1  ;;  %2208 = vst.msk [vmem:[%s3308_s13 + $0xb8] sm:$0xff] %vm1607_vm3, %v2772_v3  ;;  %v1976_v5 = vpop.f32.mrb[41].mxu0 }
 0x606   : > { %2237 = vst.msk [vmem:[%s3308_s13 + $0x1a0] sm:$0xff] %vm1607_vm3, %v2126_v4  ;;  %2207 = vst.msk [vmem:[%s3308_s13 + $0xb0] sm:$0xff] %vm1607_vm3, %v1976_v5 }
 0x608   : > { %v2820_v6 = vpop.f32.mrb[34].mxu1  ;;  %v2775_v7 = vpop.f32.mrb[42].mxu0 }
 0x609   : > { %2240 = vst.msk [vmem:[%s3308_s13 + $0x1b8] sm:$0xff] %vm1607_vm3, %v2820_v6  ;;  %v2136_v8 = vpop.f32.mrb[35].mxu1  ;;  %2210 = vst.msk [vmem:[%s3308_s13 + $0xc8] sm:$0xff] %vm1607_vm3, %v2775_v7  ;;  %v1986_v9 = vpop.f32.mrb[43].mxu0 }
 0x60a   : > { %2239 = vst.msk [vmem:[%s3308_s13 + $0x1b0] sm:$0xff] %vm1607_vm3, %v2136_v8  ;;  %2209 = vst.msk [vmem:[%s3308_s13 + $0xc0] sm:$0xff] %vm1607_vm3, %v1986_v9 }
 0x60c   : > { %v2823_v10 = vpop.f32.mrb[36].mxu1  ;;  %v2778_v11 = vpop.f32.mrb[44].mxu0 }
 0x60d   : > { %2242 = vst.msk [vmem:[%s3308_s13 + $0x1c8] sm:$0xff] %vm1607_vm3, %v2823_v10  ;;  %v2146_v12 = vpop.f32.mrb[37].mxu1  ;;  %2212 = vst.msk [vmem:[%s3308_s13 + $0xd8] sm:$0xff] %vm1607_vm3, %v2778_v11  ;;  %v1996_v13 = vpop.f32.mrb[45].mxu0 }
 0x60e   : > { %2241 = vst.msk [vmem:[%s3308_s13 + $0x1c0] sm:$0xff] %vm1607_vm3, %v2146_v12  ;;  %2211 = vst.msk [vmem:[%s3308_s13 + $0xd0] sm:$0xff] %vm1607_vm3, %v1996_v13 }
 0x610   : > { %v2826_v14 = vpop.f32.mrb[38].mxu1  ;;  %v2781_v15 = vpop.f32.mrb[46].mxu0 }
 0x611   : > { %2244 = vst.msk [vmem:[%s3308_s13 + $0x1d8] sm:$0xff] %vm1607_vm3, %v2826_v14  ;;  %v2156_v16 = vpop.f32.mrb[39].mxu1  ;;  %2214 = vst.msk [vmem:[%s3308_s13 + $0xe8] sm:$0xff] %vm1607_vm3, %v2781_v15  ;;  %v2006_v17 = vpop.f32.mrb[47].mxu0 }
 0x612   : > { %2243 = vst.msk [vmem:[%s3308_s13 + $0x1d0] sm:$0xff] %vm1607_vm3, %v2156_v16  ;;  %2213 = vst.msk [vmem:[%s3308_s13 + $0xe0] sm:$0xff] %vm1607_vm3, %v2006_v17 }
 0x614   : > { %v2829_v18 = vpop.f32.mrb[40].mxu1 }
 0x615   : > { %2246 = vst.msk [vmem:[%s3308_s13 + $0x1e8] sm:$0xff] %vm1607_vm3, %v2829_v18  ;;  %v2166_v19 = vpop.f32.mrb[41].mxu1 }
 0x616   : > { %2245 = vst.msk [vmem:[%s3308_s13 + $0x1e0] sm:$0xff] %vm1607_vm3, %v2166_v19 }
 0x618   : > { %v2832_v20 = vpop.f32.mrb[42].mxu1 }
 0x619   : > { %2248 = vst.msk [vmem:[%s3308_s13 + $0x1f8] sm:$0xff] %vm1607_vm3, %v2832_v20  ;;  %v2176_v21 = vpop.f32.mrb[43].mxu1 }
 0x61a   : > { %2247 = vst.msk [vmem:[%s3308_s13 + $0x1f0] sm:$0xff] %vm1607_vm3, %v2176_v21 }
 0x61b PF: > { %s17_s28 = sadd.s32 1, %s2988_s28   ;;  %s3461_s24 = smov %s2980_s26 }
 0x61c   : > { %p14_p7 = scmp.ge.s32.totalorder %s17_s28, 6   ;;  %s3462_s25 = smov %s2984_s27 }
 0x61d   : > { %s3463_s26 = smov %s3466_s29  ;;  %s3464_s27 = smov %s3470_s30 }
 0x61e   :  { %16 = sbr.rel (!%p14_p7) target bundleno = 3 (0x3), region = 96 }

</bundles_post_ra>
